<compile_context>
chip_gen: v7x
topology: tpu7x:2x2x1
jax: 0.10.0
libtpu: 0.0.40
codegen_flags: <defaults>
</compile_context>

<pallas_src>
import functools

import jax
import jax.numpy as jnp
import numpy as np
from jax.experimental import pallas as pl
from jax.experimental.pallas import tpu as pltpu


# ------------------------------- helpers ----------------------------------- #

def _round_up(x, m):
    return (x + m - 1) // m * m


def fold_bn(gamma, beta, mean, var, eps=1e-5):
    scale = gamma / jnp.sqrt(var + eps)
    bias = beta - mean * scale
    return scale, bias


def avgpool2x2(x_nhwc):
    # TODO(synk): assumes even H and W (same as the reference / PyTorch add).
    n, h, w, c = x_nhwc.shape
    return x_nhwc.reshape(n, h // 2, 2, w // 2, 2, c).mean(axis=(2, 4))


# ------------------- fused 1x1-conv (matmul) + BN kernel ------------------- #

def _matmul_bn_kernel(x_ref, w_ref, b_ref, *rest, apply_relu, has_res):
    if has_res:
        res_ref, o_ref = rest
    else:
        (o_ref,) = rest
    out = jnp.dot(x_ref[...], w_ref[...], preferred_element_type=jnp.float32)
    out = out + b_ref[...]
    if has_res:
        out = out + res_ref[...].astype(jnp.float32)
    if apply_relu:
        out = jnp.maximum(out, 0.0)
    o_ref[...] = out.astype(o_ref.dtype)


def _fused_matmul_bn(x2d, w, bias, res2d=None, apply_relu=True,
                     out_dtype=jnp.bfloat16):
    """x2d: (M,K) bf16, w: (K,Np) bf16 (BN scale folded), bias: (Np,) f32,
    res2d: (M,Np) bf16 or None.  Np is a multiple of 128.  The weight is
    VMEM-resident (single K step, constant index_map)."""
    m, k = x2d.shape
    k2, np_ = w.shape
    assert k == k2 and np_ % 128 == 0
    # Bottleneck-sized weights always fit VMEM comfortably (<= ~8 MiB bf16).
    assert k * np_ * 2 <= 16 * 1024 * 1024, "1x1 weight too large for resident path"

    tm_cap = 512 if np_ <= 1024 else 256
    tm = min(tm_cap, _round_up(m, 8))
    mp = _round_up(m, tm)
    if mp != m:
        x2d = jnp.pad(x2d, ((0, mp - m), (0, 0)))
        if res2d is not None:
            res2d = jnp.pad(res2d, ((0, mp - m), (0, 0)))

    has_res = res2d is not None
    in_specs = [
        pl.BlockSpec((tm, k), lambda i: (i, 0)),       # streamed activations
        pl.BlockSpec((k, np_), lambda i: (0, 0)),      # resident weight
        pl.BlockSpec((1, np_), lambda i: (0, 0)),      # resident bias
    ]
    args = [x2d, w, bias.reshape(1, np_).astype(jnp.float32)]
    if has_res:
        in_specs.append(pl.BlockSpec((tm, np_), lambda i: (i, 0)))
        args.append(res2d)

    flops = 2 * mp * k * np_
    bytes_accessed = ((mp * k + k * np_ + (mp * np_ if has_res else 0)) * 2
                      + np_ * 4 + mp * np_ * jnp.dtype(out_dtype).itemsize)

    kernel = functools.partial(_matmul_bn_kernel,
                               apply_relu=apply_relu, has_res=has_res)
    y = pl.pallas_call(
        kernel,
        out_shape=jax.ShapeDtypeStruct((mp, np_), out_dtype),
        grid=(mp // tm,),
        in_specs=in_specs,
        out_specs=pl.BlockSpec((tm, np_), lambda i: (i, 0)),
        compiler_params=pltpu.CompilerParams(
            dimension_semantics=("parallel",),
            vmem_limit_bytes=48 * 1024 * 1024),
        cost_estimate=pl.CostEstimate(flops=flops, transcendentals=0,
                                      bytes_accessed=bytes_accessed),
    )(*args)
    return y[:m] if mp != m else y


def conv1x1_bn(x_nhwc, w, scale, bias, residual_nhwc=None, apply_relu=True,
               out_dtype=jnp.bfloat16):
    """x may carry zero-padded extra channels (cx >= cin); output has
    Cp = round_up(Cout, 128) channels, the padded ones exactly zero."""
    n, h, wd, cx = x_nhwc.shape
    cin, cout = w.shape
    cp = _round_up(cout, 128)
    wf = w * scale[None, :]                                   # fold BN scale (f32)
    wf = jnp.pad(wf, ((0, cx - cin), (0, cp - cout))).astype(jnp.bfloat16)
    bp = jnp.pad(bias, (0, cp - cout)).astype(jnp.float32)
    x2d = x_nhwc.reshape(-1, cx).astype(jnp.bfloat16)
    res2d = None
    if residual_nhwc is not None:
        cr = residual_nhwc.shape[-1]
        res2d = residual_nhwc.reshape(-1, cr).astype(jnp.bfloat16)
        if cr < cp:
            res2d = jnp.pad(res2d, ((0, 0), (0, cp - cr)))
    y = _fused_matmul_bn(x2d, wf, bp, res2d, apply_relu, out_dtype)
    return y.reshape(n, h, wd, cp)


# ----------------------- direct 3x3-conv + BN kernel ----------------------- #

def _conv3x3_kernel(x_ref, w_ref, b_ref, o_ref, *, ho, wo_p, cin, stride,
                    apply_relu):
    # stride==1: x_ref is (Hp, Wp, cin); stride==2: (Hh, 2, Wh, 2*cin) where
    # the trailing 2*cin lanes are [even-column channels | odd-column channels].
    if stride == 2:
        x_par = (x_ref[:, 0], x_ref[:, 1])          # row parity 0 / 1
    acc = None
    for dy in range(3):
        if stride == 1:
            rows = x_ref[dy:dy + ho, :, :]                       # (ho, Wp, cin)
            parts = [rows[:, dx:dx + wo_p, :] for dx in range(3)]
        else:
            py, ry = dy % 2, dy // 2
            rows = x_par[py][ry:ry + ho]                         # (ho, Wh, 2cin)
            parts = [rows[:, (dx // 2):(dx // 2) + wo_p,
                          (dx % 2) * cin:(dx % 2 + 1) * cin]
                     for dx in range(3)]
        # One deep matmul per dy: (ho*wo_p, 3*cin) x (3*cin, cp).
        patch = jnp.concatenate(parts, axis=-1).reshape(ho * wo_p, 3 * cin)
        contrib = jnp.dot(patch, w_ref[dy], preferred_element_type=jnp.float32)
        acc = contrib if acc is None else acc + contrib
    out = acc + b_ref[...]
    if apply_relu:
        out = jnp.maximum(out, 0.0)
    o_ref[...] = out.reshape(ho, wo_p, -1).astype(o_ref.dtype)


def conv3x3_bn(x_nhwc, w_hwio, scale, bias, stride=1, apply_relu=True,
               out_dtype=jnp.bfloat16):
    """Direct 3x3 conv (pad=1) + folded BN + ReLU.  One image per grid step,
    no im2col materialization, no HBM strided-copy for stride=2."""
    assert stride in (1, 2)
    n, h, wd, cx = x_nhwc.shape
    kh, kw, cin, cout = w_hwio.shape
    assert (kh, kw) == (3, 3) and cx % 128 == 0
    cp = _round_up(cout, 128)
    ho = (h + 2 - 3) // stride + 1
    wo = (wd + 2 - 3) // stride + 1
    wo_p = _round_up(wo, 8)               # sublane-aligned output width

    # Fold BN scale into the weights; pad channels; layout (3, 3*cx, cp) with
    # wk[dy, dx*cx + c, :] = w[dy, dx, c, :].
    wf = w_hwio * scale[None, None, None, :]
    wf = jnp.pad(wf, ((0, 0), (0, 0), (0, cx - cin), (0, cp - cout)))
    wk = wf.reshape(3, 3 * cx, cp).astype(jnp.bfloat16)
    bp = jnp.pad(bias, (0, cp - cout)).astype(jnp.float32).reshape(1, cp)

    xb = x_nhwc.astype(jnp.bfloat16)
    if stride == 1:
        wp = wo_p + 2
        x_in = jnp.pad(xb, ((0, 0), (1, 1), (1, wp - wd - 1), (0, 0)))
        x_spec = pl.BlockSpec((None, h + 2, wp, cx), lambda ni: (ni, 0, 0, 0))
    else:
        hp = 2 * ho + 2
        wp = 2 * wo_p + 2
        xp = jnp.pad(xb, ((0, 0), (1, hp - h - 1), (1, wp - wd - 1), (0, 0)))
        # Metadata-only reshape: rows -> (row//2, parity); columns fold their
        # parity into the channel (lane) dim: col -> (col//2, parity*cx + c).
        x_in = xp.reshape(n, hp // 2, 2, wp // 2, 2 * cx)
        x_spec = pl.BlockSpec((None, hp // 2, 2, wp // 2, 2 * cx),
                              lambda ni: (ni, 0, 0, 0, 0))

    flops = 2 * n * ho * wo_p * (9 * cx) * cp
    bytes_accessed = (int(x_in.size) + int(wk.size)) * 2 + int(bp.size) * 4 \
        + n * ho * wo_p * cp * jnp.dtype(out_dtype).itemsize

    kernel = functools.partial(_conv3x3_kernel, ho=ho, wo_p=wo_p, cin=cx,
                               stride=stride, apply_relu=apply_relu)
    y = pl.pallas_call(
        kernel,
        out_shape=jax.ShapeDtypeStruct((n, ho, wo_p, cp), out_dtype),
        grid=(n,),
        in_specs=[
            x_spec,
            pl.BlockSpec((3, 3 * cx, cp), lambda ni: (0, 0, 0)),   # resident
            pl.BlockSpec((1, cp), lambda ni: (0, 0)),              # resident
        ],
        out_specs=pl.BlockSpec((None, ho, wo_p, cp), lambda ni: (ni, 0, 0, 0)),
        compiler_params=pltpu.CompilerParams(
            dimension_semantics=("parallel",),
            vmem_limit_bytes=48 * 1024 * 1024),
        cost_estimate=pl.CostEstimate(flops=flops, transcendentals=0,
                                      bytes_accessed=bytes_accessed),
    )(x_in, wk, bp)
    return y[:, :, :wo, :] if wo_p != wo else y


# ----------------------------- Bottleneck module --------------------------- #

def _bn_params(key, c):
    k1, k2, k3, k4 = jax.random.split(key, 4)
    gamma = 0.5 + jax.random.uniform(k1, (c,), jnp.float32)
    beta = 0.1 * jax.random.normal(k2, (c,), jnp.float32)
    mean = 0.1 * jax.random.normal(k3, (c,), jnp.float32)
    var = 0.5 + jax.random.uniform(k4, (c,), jnp.float32)
    return dict(gamma=gamma, beta=beta, mean=mean, var=var)


class BottleneckPallas:
    def __init__(self, key, inplanes, planes_1, planes_2, planes_3, stride=1):
        self.inplanes, self.planes_3, self.stride = inplanes, planes_3, stride
        ks = jax.random.split(key, 8)
        self.w1 = 0.2 * jax.random.normal(ks[0], (inplanes, planes_1), jnp.float32)
        self.w2_hwio = 0.2 * jax.random.normal(ks[1], (3, 3, planes_1, planes_2),
                                               jnp.float32)
        self.w3 = 0.2 * jax.random.normal(ks[2], (planes_2, planes_3), jnp.float32)
        self.bn1 = _bn_params(ks[3], planes_1)
        self.bn2 = _bn_params(ks[4], planes_2)
        self.bn3 = _bn_params(ks[5], planes_3)
        self.has_downsample = (stride == 2) or (inplanes != planes_3)
        if self.has_downsample:
            self.wd = 0.2 * jax.random.normal(ks[6], (inplanes, planes_3), jnp.float32)
            self.bnd = _bn_params(ks[7], planes_3)

    def forward_nhwc(self, x):
        s1, b1 = fold_bn(**self.bn1)
        s2, b2 = fold_bn(**self.bn2)
        s3, b3 = fold_bn(**self.bn3)

        xb = x.astype(jnp.bfloat16)
        out = conv1x1_bn(xb, self.w1, s1, b1, apply_relu=True)             # bf16
        out = conv3x3_bn(out, self.w2_hwio, s2, b2, stride=self.stride,
                         apply_relu=True)                                  # bf16

        if self.stride == 2:
            sd, bd = fold_bn(**self.bnd)
            identity = avgpool2x2(x).astype(jnp.bfloat16)
            identity = conv1x1_bn(identity, self.wd, sd, bd, apply_relu=False)
        elif self.inplanes != self.planes_3:
            sd, bd = fold_bn(**self.bnd)
            identity = conv1x1_bn(xb, self.wd, sd, bd, apply_relu=False)
        else:
            identity = xb

        # conv3 + bn3 + residual add + final ReLU fused in one kernel (f32 out)
        out = conv1x1_bn(out, self.w3, s3, b3, residual_nhwc=identity,
                         apply_relu=True, out_dtype=jnp.float32)
        return out[..., :self.planes_3]          # drop lane-padding channels

    def __call__(self, x_nchw):
        x = jnp.transpose(x_nchw, (0, 2, 3, 1))  # -> NHWC
        out = self.forward_nhwc(x)
        return jnp.transpose(out, (0, 3, 1, 2))  # -> NCHW


# ----------------------------- pure-JAX reference -------------------------- #

def _ref_bn(x, p, eps=1e-5):
    return (x - p["mean"]) / jnp.sqrt(p["var"] + eps) * p["gamma"] + p["beta"]


def _ref_conv(x_nhwc, w_hwio, stride, padding):
    return jax.lax.conv_general_dilated(
        x_nhwc, w_hwio, (stride, stride), padding,
        dimension_numbers=("NHWC", "HWIO", "NHWC"))


def bottleneck_ref(m: BottleneckPallas, x_nchw):
    x = jnp.transpose(x_nchw, (0, 2, 3, 1))
    cin, c1 = m.w1.shape
    out = _ref_conv(x, m.w1.reshape(1, 1, cin, c1), 1, "VALID")
    out = jnp.maximum(_ref_bn(out, m.bn1), 0.0)
    out = _ref_conv(out, m.w2_hwio, m.stride, [(1, 1), (1, 1)])
    out = jnp.maximum(_ref_bn(out, m.bn2), 0.0)
    out = _ref_conv(out, m.w3.reshape(1, 1, *m.w3.shape), 1, "VALID")
    out = _ref_bn(out, m.bn3)
    if m.stride == 2:
        idn = avgpool2x2(x)
        idn = _ref_conv(idn, m.wd.reshape(1, 1, *m.wd.shape), 1, "VALID")
        idn = _ref_bn(idn, m.bnd)
    elif m.inplanes != m.planes_3:
        idn = _ref_conv(x, m.wd.reshape(1, 1, *m.wd.shape), 1, "VALID")
        idn = _ref_bn(idn, m.bnd)
    else:
        idn = x
    out = jnp.maximum(out + idn, 0.0)
    return jnp.transpose(out, (0, 3, 1, 2))


# ----------------------------------- main ---------------------------------- #

if __name__ == "__main__":
    key = jax.random.PRNGKey(0)
    k_param, k_param2, k_x, k_x2 = jax.random.split(key, 4)

    # Case 1: stride=2 -> downsample = AvgPool2d(2,2) + conv1x1 + BN
    m1 = BottleneckPallas(k_param, inplanes=8, planes_1=8, planes_2=8,
                          planes_3=16, stride=2)
    x1 = jax.random.normal(k_x, (2, 8, 8, 8), jnp.float32)          # NCHW
    y1 = jax.block_until_ready(m1(x1))
    r1 = jax.block_until_ready(bottleneck_ref(m1, x1))
    np.testing.assert_allclose(np.asarray(y1), np.asarray(r1), rtol=2e-2, atol=2e-2)

    # Case 2: stride=1, inplanes == planes_3 -> identity residual
    m2 = BottleneckPallas(k_param2, inplanes=16, planes_1=8, planes_2=8,
                          planes_3=16, stride=1)
    x2 = jax.random.normal(k_x2, (2, 16, 8, 8), jnp.float32)        # NCHW
    y2 = jax.block_until_ready(m2(x2))
    r2 = jax.block_until_ready(bottleneck_ref(m2, x2))
    np.testing.assert_allclose(np.asarray(y2), np.asarray(r2), rtol=2e-2, atol=2e-2)

    print("KERNEL_OK")
</pallas_src>

<mosaic_0001>
module attributes {stable_mosaic.version = 11 : i64} {
  func.func @_matmul_bn_kernel(%arg0: i32, %arg1: memref<128x8xbf16, #tpu.memory_space<vmem>>, %arg2: memref<8x128xbf16, #tpu.memory_space<vmem>>, %arg3: memref<1x128xf32, #tpu.memory_space<vmem>>, %arg4: memref<128x128xbf16, #tpu.memory_space<vmem>>) attributes {dimension_semantics = [#tpu.dimension_semantics<parallel>], iteration_bounds = array<i64: 1>, scalar_prefetch = 0 : i64, scratch_operands = 0 : i64, tpu.core_type = #tpu.core_type<tc>, window_params = [{transform_indices = @transform_0, window_bounds = array<i64: 128, 8>}, {pipeline_mode = #tpu.pipeline_mode<synchronous>, transform_indices = @transform_1, window_bounds = array<i64: 8, 128>}, {pipeline_mode = #tpu.pipeline_mode<synchronous>, transform_indices = @transform_2, window_bounds = array<i64: 1, 128>}, {transform_indices = @transform_3, window_bounds = array<i64: 128, 128>}]} {
    %c0 = arith.constant 0 : index
    %c0_0 = arith.constant 0 : index
    %0 = vector.load %arg1[%c0, %c0_0] : memref<128x8xbf16, #tpu.memory_space<vmem>>, vector<128x8xbf16>
    %c0_1 = arith.constant 0 : index
    %c0_2 = arith.constant 0 : index
    %1 = vector.load %arg2[%c0_1, %c0_2] : memref<8x128xbf16, #tpu.memory_space<vmem>>, vector<8x128xbf16>
    %cst = arith.constant dense<0.000000e+00> : vector<128x128xf32>
    %2 = tpu.matmul %0, %1, %cst {dimension_numbers = #tpu.dot_dimension_numbers<[1], [0], [0], [1], [0, 0, 1, 1], [], []>} : vector<128x8xbf16>, vector<8x128xbf16>, vector<128x128xf32> -> vector<128x128xf32>
    %c0_3 = arith.constant 0 : index
    %c0_4 = arith.constant 0 : index
    %3 = vector.load %arg3[%c0_3, %c0_4] : memref<1x128xf32, #tpu.memory_space<vmem>>, vector<1x128xf32>
    %4 = vector.broadcast %3 : vector<1x128xf32> to vector<128x128xf32>
    %5 = arith.addf %2, %4 : vector<128x128xf32>
    %cst_5 = arith.constant 0.000000e+00 : f32
    %6 = vector.broadcast %cst_5 : f32 to vector<128x128xf32>
    %7 = arith.maximumf %5, %6 : vector<128x128xf32>
    %8 = arith.truncf %7 : vector<128x128xf32> to vector<128x128xbf16>
    %c0_6 = arith.constant 0 : index
    %c0_7 = arith.constant 0 : index
    %9 = vector.load %arg4[%c0_6, %c0_7] : memref<128x128xbf16, #tpu.memory_space<vmem>>, vector<128x128xbf16>
    tpu.vector_store %arg4[%c0_6, %c0_7], %8 {strides = array<i32>} : memref<128x128xbf16, #tpu.memory_space<vmem>>, vector<128x128xbf16>,
    return
  }
  func.func @transform_0(%arg0: i32) -> (i32, i32) {
    %c0_i32 = arith.constant 0 : i32
    %c0_i32_0 = arith.constant 0 : i32
    return %arg0, %c0_i32 : i32, i32
  }
  func.func @transform_1(%arg0: i32) -> (i32, i32) {
    %c0_i32 = arith.constant 0 : i32
    %c0_i32_0 = arith.constant 0 : i32
    %c0_i32_1 = arith.constant 0 : i32
    return %c0_i32, %c0_i32_0 : i32, i32
  }
  func.func @transform_2(%arg0: i32) -> (i32, i32) {
    %c0_i32 = arith.constant 0 : i32
    %c0_i32_0 = arith.constant 0 : i32
    %c0_i32_1 = arith.constant 0 : i32
    return %c0_i32, %c0_i32_0 : i32, i32
  }
  func.func @transform_3(%arg0: i32) -> (i32, i32) {
    %c0_i32 = arith.constant 0 : i32
    %c0_i32_0 = arith.constant 0 : i32
    return %arg0, %c0_i32 : i32, i32
  }
}

</mosaic_0001>

<bundles_post_ra>
// kernel: tpu_custom_call.1
= control target key start
LH: loop header
LB: loop body
LE: loop exit
PB: predicated region body
PF: predicated region fallthrough
CT: control target
= control target key end

     0   :  { %vm105_vm0 = vcmask 1043456   ;;  %vm80_vm1 = vcmask 64512   ;;  %s553_s0 = inlined_call_operand.vmem [shape: bf16[128,8], index: 0, kind: input, shape index: {}]   ;;  %s554_s1 = inlined_call_operand.vmem [shape: bf16[8,128], index: 1, kind: input, shape index: {}]   ;;  %s555_s2 = inlined_call_operand.vmem [shape: f32[1,128], index: 2, kind: input, shape index: {}]   ;;  %s556_s3 = inlined_call_operand.hbm [shape: bf16[128,128], index: 3, kind: output, shape index: {}]  }
   0x1   :  { %v32_v0 = vld [vmem:[%s554_s1] sm:$0xf]  ;;  %v450_v4 = vld [vmem:[%s553_s0 + $0x8] sm:$0xff]   ;;  %v452_v6 = vld [vmem:[%s553_s0 + $0x10] sm:$0xff]  }
   0x2   :  { %v448_v1 = vld [vmem:[%s553_s0] sm:$0xff]   ;;  %443 = vmatprep.subr.msk.bf16.mxu0 %vm105_vm0, %v32_v0  ;;  %444 = vmatprep.subr.msk.bf16.mxu1 %vm105_vm0, %v32_v0  ;;  %v107_v2 = vsel %vm105_vm0, %v32_v0, 0  ;;  %v451_v5 = vld [vmem:[%s553_s0 + $0x28] sm:$0xff]   ;;  %v453_v7 = vld [vmem:[%s553_s0 + $0x30] sm:$0xff]  }
   0x3   :  { %424 = vmatpush3.bf16.msra.mxu0 %v107_v2  ;;  %442 = vmatpush3.bf16.msra.mxu1 %v107_v2  ;;  %v449_v3 = vld [vmem:[%s553_s0 + $0x20] sm:$0xff]  }
   0x4   :  { %425 = vmatprep.mubr.msk.bf16.mxu0 %vm80_vm1, %v448_v1  ;;  %433 = vmatprep.mubr.msk.bf16.mxu1 %vm80_vm1, %v449_v3 }
   0x6   :  { %426 = vmatmul.mubr.msk.bf16.vlgmr.msra.gmra.mrb[0].mxu0 %vm80_vm1, %v450_v4  ;;  %434 = vmatmul.mubr.msk.bf16.vlgmr.msra.gmra.mrb[0].mxu1 %vm80_vm1, %v451_v5 }
   0x7   :  { %429 = vmatprep.mubr.msk.bf16.mxu0 %vm80_vm1, %v452_v6  ;;  %437 = vmatprep.mubr.msk.bf16.mxu1 %vm80_vm1, %v453_v7 }
   0x8   :  { %8 = vsyncpa [#allocation3], 0  ;;  %v454_v8 = vld [vmem:[%s553_s0 + $0x18] sm:$0xff]   ;;  %v318_v10 = vld [vmem:[%s555_s2] ss:$0 sm:$0xff] }
   0x9   :  { %v455_v9 = vld [vmem:[%s553_s0 + $0x38] sm:$0xff]   ;;  %s480_s0 = smov [#allocation2]  }
   0xa   :  { %s307_s2 = sshll.u32 %s480_s0, 4  ;;  %s308_s2 = int_to_ptr.vmem [resolvable:$true] %s307_s2 }
   0xb   :  { %s456_s4 = scalar_lea.vmem %s308_s2, 1024  ;;  %p461_p1 = scmp.lt.s32.totalorder %s308_s2, %s308_s2 }
   0xc   :  { %p457_p0 = scmp.ne.s32.totalorder %s308_s2, %s456_s4  ;;  %p462_p2 = scmp.lt.s32.totalorder %s456_s4, %s456_s4 }
   0xe   :  { %430 = vmatmul.mubr.msk.bf16.gmra.mrb[4].mxu0 %vm80_vm1, %v454_v8  ;;  %438 = vmatmul.mubr.msk.bf16.gmra.mrb[4].mxu1 %vm80_vm1, %v455_v9  ;;  %p463_p3 = por %p462_p2, %p461_p1 }
  0x10   :  { %p464_p4 = pnand %p463_p3, %p457_p0 }
  0xd9   :  { %v427_v11 = vpop.f32.mrb[0].mxu0  ;;  %v435_v13 = vpop.f32.mrb[0].mxu1 }
  0xda   :  { %v152_v12 = vadd.f32 %v427_v11, %v318_v10  ;;  %v143_v14 = vpop.f32.mrb[1].mxu0  ;;  %v184_v15 = vadd.f32 %v435_v13, %v318_v10  ;;  %v175_v17 = vpop.f32.mrb[1].mxu1 }
  0xdb   :  { %v144_v16 = vadd.f32 %v318_v10, %v143_v14  ;;  %v428_v18 = vpop.f32.mrb[2].mxu0  ;;  %v176_v19 = vadd.f32 %v318_v10, %v175_v17  ;;  %v436_v21 = vpop.f32.mrb[2].mxu1 }
  0xdc   :  { %v155_v20 = vadd.f32 %v428_v18, %v318_v10  ;;  %v146_v22 = vpop.f32.mrb[3].mxu0  ;;  %v187_v23 = vadd.f32 %v436_v21, %v318_v10  ;;  %v178_v25 = vpop.f32.mrb[3].mxu1  ;;  %v208_v26 = vmax.f32 %v152_v12, 0.0  ;;  %v216_v29 = vmax.f32 %v184_v15, 0.0 }
  0xdd   :  { %v147_v24 = vadd.f32 %v318_v10, %v146_v22  ;;  %v179_v28 = vadd.f32 %v318_v10, %v178_v25  ;;  %v206_v30 = vmax.f32 %v144_v16, 0.0  ;;  %v214_v33 = vmax.f32 %v176_v19, 0.0 }
  0xde   :  { %v209_v27 = vmax.f32 %v155_v20, 0.0  ;;  %v217_v31 = vmax.f32 %v187_v23, 0.0 }
  0xdf   :  { %v207_v32 = vmax.f32 %v147_v24, 0.0  ;;  %v215_v35 = vmax.f32 %v179_v28, 0.0 }
  0xe0   :  { %v375_v34 = vpack.c.bf16 %v209_v27, %v208_v26  ;;  %v395_v36 = vpack.c.bf16 %v217_v31, %v216_v29 }
  0xe1   :  { %v370_v37 = vpack.c.bf16 %v207_v32, %v206_v30  ;;  %v431_v38 = vpop.f32.mrb[4].mxu0  ;;  %v390_v39 = vpack.c.bf16 %v215_v35, %v214_v33  ;;  %v439_v41 = vpop.f32.mrb[4].mxu1 }
  0xe2   :  { %407 = vst [vmem:[#allocation2 + $0x8] sm:$0xff] %v375_v34   ;;  %v168_v40 = vadd.f32 %v431_v38, %v318_v10  ;;  %v159_v42 = vpop.f32.mrb[5].mxu0  ;;  %411 = vst [vmem:[#allocation2 + $0x28] sm:$0xff] %v395_v36   ;;  %v200_v43 = vadd.f32 %v439_v41, %v318_v10  ;;  %v191_v45 = vpop.f32.mrb[5].mxu1 }
  0xe3   :  { %371 = vst [vmem:[#allocation2] sm:$0xff] %v370_v37   ;;  %v160_v44 = vadd.f32 %v318_v10, %v159_v42  ;;  %v432_v46 = vpop.f32.mrb[6].mxu0  ;;  %410 = vst [vmem:[#allocation2 + $0x20] sm:$0xff] %v390_v39   ;;  %v192_v47 = vadd.f32 %v318_v10, %v191_v45  ;;  %v440_v49 = vpop.f32.mrb[6].mxu1 }
  0xe4   :  { %v171_v48 = vadd.f32 %v432_v46, %v318_v10  ;;  %v162_v50 = vpop.f32.mrb[7].mxu0  ;;  %v203_v51 = vadd.f32 %v440_v49, %v318_v10  ;;  %v194_v53 = vpop.f32.mrb[7].mxu1  ;;  %v212_v54 = vmax.f32 %v168_v40, 0.0  ;;  %v220_v57 = vmax.f32 %v200_v43, 0.0 }
  0xe5   :  { %v163_v52 = vadd.f32 %v318_v10, %v162_v50  ;;  %v195_v56 = vadd.f32 %v318_v10, %v194_v53  ;;  %v210_v58 = vmax.f32 %v160_v44, 0.0  ;;  %v218_v61 = vmax.f32 %v192_v47, 0.0 }
  0xe6   :  { %v213_v55 = vmax.f32 %v171_v48, 0.0  ;;  %v221_v59 = vmax.f32 %v203_v51, 0.0 }
  0xe7   :  { %v211_v60 = vmax.f32 %v163_v52, 0.0  ;;  %v219_v63 = vmax.f32 %v195_v56, 0.0 }
  0xe8   :  { %v385_v62 = vpack.c.bf16 %v213_v55, %v212_v54  ;;  %v405_v0 = vpack.c.bf16 %v221_v59, %v220_v57 }
  0xe9   :  { %v380_v1 = vpack.c.bf16 %v211_v60, %v210_v58  ;;  %v400_v2 = vpack.c.bf16 %v219_v63, %v218_v61 }
  0xea   :  { %409 = vst [vmem:[#allocation2 + $0x18] sm:$0xff] %v385_v62   ;;  %413 = vst [vmem:[#allocation2 + $0x38] sm:$0xff] %v405_v0  }
  0xeb   :  { %408 = vst [vmem:[#allocation2 + $0x10] sm:$0xff] %v380_v1   ;;  %412 = vst [vmem:[#allocation2 + $0x30] sm:$0xff] %v400_v2  }
  0xec   :  { %467 = shalt.err (!%p464_p4)
}
  0xed   :  { %s468_s7 = scalar_lea.hbm %s556_s3, 1024 }
  0xee   :  { %p469_p5 = scmp.ne.s32.totalorder %s556_s3, %s468_s7  ;;  %p472_p6 = scmp.lt.u32.totalorder %s468_s7, %s556_s3 }
  0xf0   :  { %p474_p7 = pnand %p472_p6, %p469_p5 }
  0xf2   :  { %477 = shalt.err (!%p474_p7)
}
  0xf3   :  { %s481_s12 = smov 64   ;;  %s482_s13 = smov 4  }
  0xf4   :  { %313 = dma.vmem_to_hbm [thread:$0]  %s308_s2, 1024, %s556_s3, [#allocation3], %s481_s12, %s481_s12, %s482_s13  }
  0xf5   :  { %478 = dma.done.wait [#allocation3], 1024  }
  0xf6   :  { %479 = vsyncadd [#allocation3], 4294966272 }
  0xf7   :  { %317 = vsyncpa [#allocation3], 1 }

</bundles_post_ra>
